<compile_context>
chip_gen: v7x
topology: tpu7x:2x2x1
jax: 0.10.0
libtpu: 0.0.40
codegen_flags: <defaults>
</compile_context>

<pallas_src>
import functools

import jax
import jax.numpy as jnp
from jax.experimental import pallas as pl
from jax.experimental.pallas import tpu as pltpu


def _embeddings_kernel(x_ref, w_ref, b_ref, gamma_ref, beta_ref, o_ref, *, eps):
    # x_ref:              (1, tt, E) pre-summed embedding tile (bf16 or f32)
    # w_ref:              (E, H)     to_hidden weight, input-major (== W_torch.T)
    # b_ref:              (1, H)     to_hidden bias (f32)
    # gamma_ref/beta_ref: (1, H)     LayerNorm scale / shift (f32)
    # o_ref:              (1, tt, H) output tile
    x = x_ref[0]

    # to_hidden: MXU matmul in the operand dtype, f32 accumulation.
    h = jnp.dot(x, w_ref[...], preferred_element_type=jnp.float32)
    h = h + b_ref[...]

    # LayerNorm over the hidden (last) dim, f32 math.
    mean = jnp.mean(h, axis=-1, keepdims=True)
    c = h - mean
    var = jnp.mean(c * c, axis=-1, keepdims=True)
    hn = c * jax.lax.rsqrt(var + eps)
    hn = hn * gamma_ref[...] + beta_ref[...]

    # TODO(synk): dropout is identity at inference; training-mode dropout would
    # use pltpu.prng_seed / pltpu.prng_random_bits.
    o_ref[0] = hn.astype(o_ref.dtype)


def _axial_position_embedding(ax_weights, axial_shape):
    """Replicates AxialPositionEncoding.forward (batch-invariant): (max_seq_len, E)."""
    max_seq_len = 1
    for s in axial_shape:
        max_seq_len *= s
    embs = []
    for w in ax_weights:                       # w: (1, *one_hot_axial_shape, d_emb)
        d = w.shape[-1]
        emb = jnp.broadcast_to(w, (1, *axial_shape, d)).reshape(1, max_seq_len, d)
        embs.append(emb)
    return jnp.concatenate(embs, axis=-1)[0]   # (max_seq_len, sum(dims))


def _round_up(x, m):
    return (x + m - 1) // m * m


def _cdiv(a, b):
    return (a + b - 1) // b


def chbert_embeddings(input_ids, params, *, task_ids=None, token_type_ids=None,
                      eps=1e-12, tt=512, mxu_dtype=jnp.bfloat16):
    """input_ids: [B, T] int32 -> embeddings [B, T, H]."""
    B, T = input_ids.shape
    E, H = params["w_hidden"].shape
    # w_hidden must be stored input-major (== W_torch.T): (embedding_size, hidden_size).
    assert params["word_emb"].shape[1] == E, (
        "w_hidden must be (embedding_size, hidden_size), i.e. the transpose of the "
        "PyTorch nn.Linear weight")
    out_dtype = params["word_emb"].dtype
    cdtype = jnp.dtype(mxu_dtype) if mxu_dtype is not None else jnp.dtype(out_dtype)

    if task_ids is None:
        task_ids = jnp.zeros((B, T), dtype=jnp.int32)
    if token_type_ids is None:
        token_type_ids = jnp.zeros((B, T), dtype=jnp.int32)

    # Row tile: round to the sublane packing of the narrowest dtype touching a
    # (tt, *) block (8 sublanes for f32, 16 for bf16, 32 for int8/fp8).
    min_itemsize = min(cdtype.itemsize, jnp.dtype(out_dtype).itemsize)
    sub = {4: 8, 2: 16, 1: 32}[min_itemsize]
    tt = max(sub, min(tt, _round_up(T, sub)))
    # v7x megacore: prefer >= 2 grid steps so both TensorCores get work.
    if B * _cdiv(T, tt) < 2 and tt > sub:
        tt = max(sub, min(tt, _round_up(_cdiv(T, 2), sub)))
    T_pad = _round_up(T, tt)

    # Pad the cheap int32 ids (not the gathered (B,T,E) tensors).  Id 0 is valid
    # for every table; padded rows are sliced off after the call.
    if T_pad != T:
        pad = ((0, 0), (0, T_pad - T))
        input_ids = jnp.pad(input_ids, pad)
        task_ids = jnp.pad(task_ids, pad)
        token_type_ids = jnp.pad(token_type_ids, pad)

    # Data-dependent table gathers + 4-way add stay in XLA (one fusion); the
    # kernel gets a single pre-summed stream in the MXU operand dtype.
    word_e = jnp.take(params["word_emb"], input_ids, axis=0)          # (B, T_pad, E)
    task_e = jnp.take(params["task_emb"], task_ids, axis=0)           # (B, T_pad, E)
    type_e = jnp.take(params["type_emb"], token_type_ids, axis=0)     # (B, T_pad, E)
    pos_e = _axial_position_embedding(params["ax_weights"],
                                      params["axial_shape"])[:T]      # (T, E)
    if T_pad != T:
        pos_e = jnp.pad(pos_e, ((0, T_pad - T), (0, 0)))
    x = (word_e + task_e + type_e + pos_e[None].astype(out_dtype)).astype(cdtype)

    w = params["w_hidden"].astype(cdtype)                             # (E, H)
    b_h = params["b_hidden"].reshape(1, H).astype(jnp.float32)
    gamma = params["ln_gamma"].reshape(1, H).astype(jnp.float32)
    beta = params["ln_beta"].reshape(1, H).astype(jnp.float32)

    kernel = functools.partial(_embeddings_kernel, eps=eps)
    grid = (B, T_pad // tt)

    # Truthful traffic estimate: one summed (B,T,E) read, params once, output write.
    cost = pl.CostEstimate(
        flops=2 * B * T_pad * E * H + 10 * B * T_pad * H,
        transcendentals=B * T_pad,                       # one rsqrt per row
        bytes_accessed=int(B * T_pad * E * cdtype.itemsize
                           + E * H * cdtype.itemsize
                           + 3 * H * 4
                           + B * T_pad * H * jnp.dtype(out_dtype).itemsize),
    )

    out = pl.pallas_call(
        kernel,
        out_shape=jax.ShapeDtypeStruct((B, T_pad, H), out_dtype),
        grid_spec=pltpu.PrefetchScalarGridSpec(
            num_scalar_prefetch=0,
            grid=grid,
            in_specs=[
                pl.BlockSpec((1, tt, E), lambda b, i: (b, i, 0)),   # summed embeddings
                pl.BlockSpec((E, H), lambda b, i: (0, 0)),          # to_hidden weight
                pl.BlockSpec((1, H), lambda b, i: (0, 0)),          # to_hidden bias
                pl.BlockSpec((1, H), lambda b, i: (0, 0)),          # LN gamma
                pl.BlockSpec((1, H), lambda b, i: (0, 0)),          # LN beta
            ],
            out_specs=pl.BlockSpec((1, tt, H), lambda b, i: (b, i, 0)),
        ),
        compiler_params=pltpu.CompilerParams(
            dimension_semantics=("parallel", "parallel"),
            vmem_limit_bytes=48 * 1024 * 1024),
        cost_estimate=cost,
    )(x, w, b_h, gamma, beta)

    if T_pad != T:
        out = out[:, :T, :]
    return out


def _reference(input_ids, task_ids, token_type_ids, params, eps=1e-12):
    """Pure-JAX reference mirroring the PyTorch forward."""
    word_e = params["word_emb"][input_ids]
    task_e = params["task_emb"][task_ids]
    type_e = params["type_emb"][token_type_ids]
    T = input_ids.shape[1]
    pos_e = _axial_position_embedding(params["ax_weights"], params["axial_shape"])[:T]
    x = word_e + task_e + pos_e[None].astype(word_e.dtype) + type_e
    h = x @ params["w_hidden"] + params["b_hidden"]
    mean = jnp.mean(h, axis=-1, keepdims=True)
    var = jnp.mean((h - mean) ** 2, axis=-1, keepdims=True)
    hn = (h - mean) * jax.lax.rsqrt(var + eps)
    return hn * params["ln_gamma"] + params["ln_beta"]


if __name__ == "__main__":
    # Small, module-consistent shapes (embedding_size == hidden_size so that
    # LayerNorm(embedding_size) after to_hidden is well-formed, as in the module;
    # axial dims sum to hidden; axial shape multiplies to max_seq_len >= seq).
    B, T = 2, 8
    E = H = 32
    VOCAB, TASKS, TYPES = 64, 4, 2
    AXIAL_SHAPE = (4, 4)            # max_seq_len = 16
    AXIAL_DIMS = (16, 16)           # sums to hidden_size
    eps = 1e-12

    key = jax.random.PRNGKey(0)
    kw, kt, ky, kwh, kbh, ka0, ka1, ki, kta, kty = jax.random.split(key, 10)

    word_emb = jax.random.normal(kw, (VOCAB, E), dtype=jnp.float32) * 0.02
    word_emb = word_emb.at[0].set(0.0)          # padding_idx=0
    ax_weights = [
        jax.random.normal(ka0, (1, AXIAL_SHAPE[0], 1, AXIAL_DIMS[0]), dtype=jnp.float32),
        jax.random.normal(ka1, (1, 1, AXIAL_SHAPE[1], AXIAL_DIMS[1]), dtype=jnp.float32),
    ]
    params = {
        "word_emb": word_emb,
        "task_emb": jax.random.normal(kt, (TASKS, E), dtype=jnp.float32) * 0.02,
        "type_emb": jax.random.normal(ky, (TYPES, E), dtype=jnp.float32) * 0.02,
        "ax_weights": ax_weights,
        "axial_shape": AXIAL_SHAPE,
        # stored input-major: equals W_torch.T so the kernel computes x @ W
        "w_hidden": jax.random.normal(kwh, (E, H), dtype=jnp.float32) * 0.02,
        "b_hidden": jax.random.normal(kbh, (H,), dtype=jnp.float32) * 0.02,
        "ln_gamma": jnp.ones((H,), dtype=jnp.float32),
        "ln_beta": jnp.zeros((H,), dtype=jnp.float32),
    }

    input_ids = jax.random.randint(ki, (B, T), 0, VOCAB, dtype=jnp.int32)
    task_ids = jax.random.randint(kta, (B, T), 0, TASKS, dtype=jnp.int32)
    token_type_ids = jax.random.randint(kty, (B, T), 0, TYPES, dtype=jnp.int32)

    ref = _reference(input_ids, task_ids, token_type_ids, params, eps=eps)

    # Exact-dtype path (f32 MXU operands): tight numerical check.
    out_f32 = chbert_embeddings(input_ids, params, task_ids=task_ids,
                                token_type_ids=token_type_ids, eps=eps,
                                mxu_dtype=None)
    out_f32 = jax.block_until_ready(out_f32)
    assert out_f32.shape == (B, T, H), out_f32.shape
    assert jnp.allclose(out_f32, ref, atol=1e-5, rtol=1e-5), \
        float(jnp.max(jnp.abs(out_f32 - ref)))

    # Default performance path (bf16 MXU operands, f32 accumulation + f32 LN);
    # also exercises the id-padding path (bf16 sublane packing rounds tt to 16 > T).
    out_bf16 = chbert_embeddings(input_ids, params, task_ids=task_ids,
                                 token_type_ids=token_type_ids, eps=eps)
    out_bf16 = jax.block_until_ready(out_bf16)
    assert out_bf16.shape == (B, T, H), out_bf16.shape
    assert jnp.allclose(out_bf16, ref, atol=5e-2, rtol=5e-2), \
        float(jnp.max(jnp.abs(out_bf16 - ref)))

    print("KERNEL_OK")
</pallas_src>

<mosaic_0001>
module attributes {stable_mosaic.version = 11 : i64} {
  func.func @_embeddings_kernel(%arg0: i32, %arg1: i32, %arg2: memref<1x8x32xf32, #tpu.memory_space<vmem>>, %arg3: memref<32x32xf32, #tpu.memory_space<vmem>>, %arg4: memref<1x32xf32, #tpu.memory_space<vmem>>, %arg5: memref<1x32xf32, #tpu.memory_space<vmem>>, %arg6: memref<1x32xf32, #tpu.memory_space<vmem>>, %arg7: memref<1x8x32xf32, #tpu.memory_space<vmem>>) attributes {dimension_semantics = [#tpu.dimension_semantics<parallel>, #tpu.dimension_semantics<parallel>], iteration_bounds = array<i64: 2, 1>, scalar_prefetch = 0 : i64, scratch_operands = 0 : i64, tpu.core_type = #tpu.core_type<tc>, window_params = [{transform_indices = @transform_0, window_bounds = array<i64: 1, 8, 32>}, {pipeline_mode = #tpu.pipeline_mode<synchronous>, transform_indices = @transform_1, window_bounds = array<i64: 32, 32>}, {pipeline_mode = #tpu.pipeline_mode<synchronous>, transform_indices = @transform_2, window_bounds = array<i64: 1, 32>}, {pipeline_mode = #tpu.pipeline_mode<synchronous>, transform_indices = @transform_3, window_bounds = array<i64: 1, 32>}, {pipeline_mode = #tpu.pipeline_mode<synchronous>, transform_indices = @transform_4, window_bounds = array<i64: 1, 32>}, {transform_indices = @transform_5, window_bounds = array<i64: 1, 8, 32>}]} {
    %c0 = arith.constant 0 : index
    %c0_0 = arith.constant 0 : index
    %c0_1 = arith.constant 0 : index
    %0 = vector.load %arg2[%c0, %c0_0, %c0_1] : memref<1x8x32xf32, #tpu.memory_space<vmem>>, vector<1x8x32xf32>
    %1 = vector.shape_cast %0 : vector<1x8x32xf32> to vector<8x32xf32>
    %c0_2 = arith.constant 0 : index
    %c0_3 = arith.constant 0 : index
    %2 = vector.load %arg3[%c0_2, %c0_3] : memref<32x32xf32, #tpu.memory_space<vmem>>, vector<32x32xf32>
    %cst = arith.constant dense<0.000000e+00> : vector<8x32xf32>
    %3 = tpu.matmul %1, %2, %cst {dimension_numbers = #tpu.dot_dimension_numbers<[1], [0], [0], [1], [0, 0, 1, 1], [], []>} : vector<8x32xf32>, vector<32x32xf32>, vector<8x32xf32> -> vector<8x32xf32>
    %c0_4 = arith.constant 0 : index
    %c0_5 = arith.constant 0 : index
    %4 = vector.load %arg4[%c0_4, %c0_5] : memref<1x32xf32, #tpu.memory_space<vmem>>, vector<1x32xf32>
    %5 = vector.broadcast %4 : vector<1x32xf32> to vector<8x32xf32>
    %6 = arith.addf %3, %5 : vector<8x32xf32>
    %cst_6 = arith.constant dense<0.000000e+00> : vector<8xf32>
    %7 = vector.multi_reduction <add>, %6, %cst_6 [1] : vector<8x32xf32> to vector<8xf32>
    %8 = vector.shape_cast %7 : vector<8xf32> to vector<8x1xf32>
    %cst_7 = arith.constant 3.200000e+01 : f32
    %9 = vector.broadcast %cst_7 : f32 to vector<8x1xf32>
    %10 = arith.divf %8, %9 : vector<8x1xf32>
    %11 = vector.broadcast %10 : vector<8x1xf32> to vector<8x32xf32>
    %12 = arith.subf %6, %11 : vector<8x32xf32>
    %13 = arith.mulf %12, %12 : vector<8x32xf32>
    %cst_8 = arith.constant dense<0.000000e+00> : vector<8xf32>
    %14 = vector.multi_reduction <add>, %13, %cst_8 [1] : vector<8x32xf32> to vector<8xf32>
    %15 = vector.shape_cast %14 : vector<8xf32> to vector<8x1xf32>
    %cst_9 = arith.constant 3.200000e+01 : f32
    %16 = vector.broadcast %cst_9 : f32 to vector<8x1xf32>
    %17 = arith.divf %15, %16 : vector<8x1xf32>
    %cst_10 = arith.constant 9.99999996E-13 : f32
    %18 = vector.broadcast %cst_10 : f32 to vector<8x1xf32>
    %19 = arith.addf %17, %18 : vector<8x1xf32>
    %20 = math.rsqrt %19 : vector<8x1xf32>
    %21 = vector.broadcast %20 : vector<8x1xf32> to vector<8x32xf32>
    %22 = arith.mulf %12, %21 : vector<8x32xf32>
    %c0_11 = arith.constant 0 : index
    %c0_12 = arith.constant 0 : index
    %23 = vector.load %arg5[%c0_11, %c0_12] : memref<1x32xf32, #tpu.memory_space<vmem>>, vector<1x32xf32>
    %24 = vector.broadcast %23 : vector<1x32xf32> to vector<8x32xf32>
    %25 = arith.mulf %22, %24 : vector<8x32xf32>
    %c0_13 = arith.constant 0 : index
    %c0_14 = arith.constant 0 : index
    %26 = vector.load %arg6[%c0_13, %c0_14] : memref<1x32xf32, #tpu.memory_space<vmem>>, vector<1x32xf32>
    %27 = vector.broadcast %26 : vector<1x32xf32> to vector<8x32xf32>
    %28 = arith.addf %25, %27 : vector<8x32xf32>
    %c0_15 = arith.constant 0 : index
    %c0_16 = arith.constant 0 : index
    %c0_17 = arith.constant 0 : index
    %29 = vector.load %arg7[%c0_15, %c0_16, %c0_17] : memref<1x8x32xf32, #tpu.memory_space<vmem>>, vector<1x8x32xf32>
    %30 = vector.shape_cast %29 : vector<1x8x32xf32> to vector<8x32xf32>
    %31 = vector.shape_cast %28 : vector<8x32xf32> to vector<1x8x32xf32>
    tpu.vector_store %arg7[%c0_15, %c0_16, %c0_17], %31 {strides = array<i32>} : memref<1x8x32xf32, #tpu.memory_space<vmem>>, vector<1x8x32xf32>,
    return
  }
  func.func @transform_0(%arg0: i32, %arg1: i32) -> (i32, i32, i32) {
    %c0_i32 = arith.constant 0 : i32
    %c0_i32_0 = arith.constant 0 : i32
    return %arg0, %arg1, %c0_i32 : i32, i32, i32
  }
  func.func @transform_1(%arg0: i32, %arg1: i32) -> (i32, i32) {
    %c0_i32 = arith.constant 0 : i32
    %c0_i32_0 = arith.constant 0 : i32
    %c0_i32_1 = arith.constant 0 : i32
    return %c0_i32, %c0_i32_0 : i32, i32
  }
  func.func @transform_2(%arg0: i32, %arg1: i32) -> (i32, i32) {
    %c0_i32 = arith.constant 0 : i32
    %c0_i32_0 = arith.constant 0 : i32
    %c0_i32_1 = arith.constant 0 : i32
    return %c0_i32, %c0_i32_0 : i32, i32
  }
  func.func @transform_3(%arg0: i32, %arg1: i32) -> (i32, i32) {
    %c0_i32 = arith.constant 0 : i32
    %c0_i32_0 = arith.constant 0 : i32
    %c0_i32_1 = arith.constant 0 : i32
    return %c0_i32, %c0_i32_0 : i32, i32
  }
  func.func @transform_4(%arg0: i32, %arg1: i32) -> (i32, i32) {
    %c0_i32 = arith.constant 0 : i32
    %c0_i32_0 = arith.constant 0 : i32
    %c0_i32_1 = arith.constant 0 : i32
    return %c0_i32, %c0_i32_0 : i32, i32
  }
  func.func @transform_5(%arg0: i32, %arg1: i32) -> (i32, i32, i32) {
    %c0_i32 = arith.constant 0 : i32
    %c0_i32_0 = arith.constant 0 : i32
    return %arg0, %arg1, %c0_i32 : i32, i32, i32
  }
}

</mosaic_0001>

<bundles_post_ra>
// kernel: tpu_custom_call.1
= control target key start
LH: loop header
LB: loop body
LE: loop exit
PB: predicated region body
PF: predicated region fallthrough
CT: control target
= control target key end

     0   :  { %10 = vsyncpa [#allocation3], 0  ;;  %s1030_s0 = inlined_call_operand.hbm [shape: f32[2,8,32], index: 0, kind: input, shape index: {}]   ;;  %s1031_s1 = inlined_call_operand.hbm [shape: f32[32,32], index: 1, kind: input, shape index: {}]   ;;  %s1032_s2 = inlined_call_operand.vmem [shape: f32[1,32], index: 2, kind: input, shape index: {}]   ;;  %s1033_s3 = inlined_call_operand.vmem [shape: f32[1,32], index: 3, kind: input, shape index: {}]   ;;  %s1034_s4 = inlined_call_operand.vmem [shape: f32[1,32], index: 4, kind: input, shape index: {}]   ;;  %s1035_s5 = inlined_call_operand.hbm [shape: f32[2,8,32], index: 5, kind: output, shape index: {}]  }
   0x1   :  { %12 = vsyncpa [#allocation3 + $0x1], 0 }
   0x2   :  { %13 = vsyncpa [#allocation6], 0 }
   0x3   :  { %14 = vsyncpa [#allocation4], 0 }
   0x4   :  { %16 = vsyncpa [#allocation4 + $0x1], 0  ;;  %s799_s18 = smov 0   ;;  %s801_s19 = smov 0  }
   0x5   :  { %s803_s20 = smov 0   ;;  %s805_s21 = smov 0  }
   0x6   :  { %s807_s22 = smov 0   ;;  %s809_s23 = smov 0  }
   0x7 LB: > { %s494_s24 = sadd.s32 4294967295, %s759_s23   ;;  %s495_s25 = sadd.s32 4294967294, %s759_s23   ;;  %s759_s23 = sphi %s809_s23, %s22_s23   ;;  %s755_s22 = sphi %s807_s22, %s1059_s22   ;;  %s751_s21 = sphi %s805_s21, %s1058_s21   ;;  %s747_s20 = sphi %s803_s20, %s1057_s20   ;;  %s743_s19 = sphi %s801_s19, %s1056_s19   ;;  %s739_s18 = sphi %s799_s18, %s1055_s18  }
   0x8   : > { %p56_p0 = scmp.ne.s32.totalorder %s743_s19, %s739_s18  ;;  %p833_p1 = scmp.eq.s32.totalorder %s494_s24, 0 }
   0x9   : > { %p837_p2 = scmp.eq.s32.totalorder %s494_s24, 1  ;;  %p172_p3 = scmp.eq.s32.totalorder %s495_s25, 1 }
   0xa   : > { %s1040_s26 = scalar_select %p833_p1, 1, 0 }
   0xb   : > { %s1041_s27 = scalar_select %p837_p2, 1, 0 }
   0xc   : > { %p843_p4 = por %p833_p1, %p56_p0  ;;  %p496_p5 = scmp.ge.s32.totalorder %s759_s23, 1 }
   0xd   : > { %p848_p6 = por %p172_p3, %p56_p0  ;;  %p179_p7 = scmp.lt.s32.totalorder %s759_s23, 3 }
   0xe   : > { %s1042_s28 = scalar_select %p843_p4, 1, 0 }
   0xf   : > { %s1043_s29 = scalar_select %p848_p6, 1, 0 }
  0x10   : > { %p853_p8 = pnand %p496_p5, %p179_p7  ;;  %s761_s6 = smov [#allocation5]  }
  0x11   : > { %s191_s7 = sshll.u32 %s761_s6, 4  ;;  %s34_s9 = sadd.s32 1, %s755_s22  ;;  %s192_s7 = int_to_ptr.vmem [resolvable:$true] %s191_s7 }
  0x12   : > { %s1044_s30 = scalar_select %p853_p8, 1, 0 }
  0x13   : > { %p543_p9 = pneg %p853_p8  ;;  %s615_s12 = scalar_lea.hbm %s1031_s1, 512 }
  0x14   : > { %p616_p12 = scmp.ne.s32.totalorder %s1031_s1, %s615_s12  ;;  %p622_p5 = scmp.lt.u32.totalorder %s615_s12, %s1031_s1 }
  0x15   : > { %p862_p11 = pnand %p543_p9, %p833_p1 }
  0x17   : > { %p617_p13 = pneg %p862_p11 }
  0x19   : > { %p618_p0 = pnand %p617_p13, %p616_p12 }
  0x1b   : > { %p619_p3 = pneg %p618_p0 }
  0x1d   : > { %p624_p7 = pnand %p622_p5, %p619_p3 }
  0x1f   : > { %627 = shalt.err (!%p624_p7)
}
  0x20   : > { %s628_s17 = scalar_lea.vmem %s192_s7, 512  ;;  %p636_p1 = scmp.lt.s32.totalorder %s192_s7, %s192_s7 }
  0x21   : > { %p629_p9 = scmp.ne.s32.totalorder %s192_s7, %s628_s17  ;;  %p637_p4 = scmp.lt.s32.totalorder %s628_s17, %s628_s17 }
  0x23   : > { %p631_p10 = pnand %p629_p9, %p617_p13  ;;  %p638_p8 = por %p637_p4, %p636_p1 }
  0x25   : > { %p632_p6 = pneg %p631_p10 }
  0x27   : > { %p639_p2 = pnand %p638_p8, %p632_p6 }
  0x29   : > { %642 = shalt.err (!%p639_p2)
}
  0x2a   : > { %s762_s24 = smov 128   ;;  %s763_s25 = smov 8  }
  0x2b   : > { %546 = dma.hbm_to_vmem [thread:$0]  (!%p862_p11), %s1031_s1, 512, %s192_s7, [#allocation6], %s762_s24, %s762_s24, %s763_s25  }
  0x2c   : > { %p36_p1 = scmp.ge.s32.totalorder %s34_s9, 2  ;;  %s43_s11 = sadd.s32 1, %s747_s20 }
  0x2d   : > { %p50_p2 = scmp.ne.s32.totalorder %s747_s20, %s743_s19  ;;  %p51_p4 = scmp.eq.s32.totalorder %s759_s23, 0 }
  0x2e   : > { %s1061_s9 = smov (%p36_p1, %s34_s9), 0  ;;  %p1047_p8 = scmp.ne.s32.totalorder %s1041_s27, 0 }
  0x2f   : > { %p889_p6 = por %p51_p4, %p50_p2  ;;  %s38_s8 = ssub.s32 %s755_s22, %s1061_s9 }
  0x30   : > { %p895_p10 = por %p1047_p8, %p50_p2  ;;  %p556_p12 = scmp.lt.s32.totalorder %s759_s23, 2 }
  0x31   : > { %p41_p11 = scmp.eq.s32.totalorder %s38_s8, 0  ;;  %s214_s7 = sand.u32 1, %s747_s20  }
  0x32   : > { %s499_s14 = sshll.u32 %s214_s7, 3  ;;  %s500_s16 = sshll.u32 %s755_s22, 7 }
  0x33   : > { %s904_s15 = scalar_select %p41_p11, %s747_s20, %s43_s11  }
  0x34   : > { %s910_s25 = scalar_lea.hbm %s1030_s0, %s500_s16  ;;  %s218_s27 = scalar_lea.vmem [#allocation2], %s499_s14 }
  0x35   : > { %s226_s6 = sshll.u32 %s218_s27, 4  ;;  %p916_p13 = pnand %p556_p12, %p889_p6  ;;  %s912_s6 = int_to_ptr.vmem [resolvable:$true] %s226_s6 }
  0x36   : > { %s215_s11 = scalar_lea.sflag [#allocation3], %s214_s7  ;;  %s643_s8 = scalar_lea.hbm %s910_s25, 128 }
  0x37   : > { %p644_p0 = scmp.ne.s32.totalorder %s910_s25, %s643_s8  ;;  %p645_p3 = pneg %p916_p13 }
  0x38   : > { %s648_s17 = scalar_lea.hbm %s1030_s0, 256  ;;  %p649_p9 = scmp.lt.u32.totalorder %s910_s25, %s1030_s0 }
  0x39   : > { %p646_p5 = pnand %p645_p3, %p644_p0  ;;  %p650_p1 = scmp.lt.u32.totalorder %s648_s17, %s643_s8 }
  0x3a   : > { %p652_p4 = scmp.lt.u32.totalorder %s643_s8, %s910_s25 }
  0x3b   : > { %p647_p7 = pneg %p646_p5  ;;  %p651_p2 = por %p650_p1, %p649_p9 }
  0x3d   : > { %p653_p6 = por %p652_p4, %p651_p2 }
  0x3f   : > { %p654_p8 = pnand %p653_p6, %p647_p7 }
  0x41   : > { %657 = shalt.err (!%p654_p8)
}
  0x42   : > { %s658_s7 = scalar_lea.vmem %s912_s6, 128  ;;  %s764_s27 = smov [#allocation2]  }
  0x43   : > { %p659_p12 = scmp.ne.s32.totalorder %s912_s6, %s658_s7  ;;  %s663_s14 = sshll.u32 %s764_s27, 4  ;;  %s664_s14 = int_to_ptr.vmem [resolvable:$false] %s663_s14 }
  0x44   : > { %s665_s16 = scalar_lea.vmem %s664_s14, 256  ;;  %p666_p5 = scmp.lt.s32.totalorder %s912_s6, %s664_s14 }
  0x45   : > { %p661_p11 = pnand %p659_p12, %p645_p3  ;;  %p667_p9 = scmp.lt.s32.totalorder %s665_s16, %s658_s7 }
  0x47   : > { %p662_p0 = pneg %p661_p11  ;;  %p668_p1 = por %p667_p9, %p666_p5 }
  0x49   : > { %p669_p2 = pnand %p668_p1, %p662_p0 }
  0x4b   : > { %672 = shalt.err (!%p669_p2)
}
  0x4c   : > { %550 = dma.hbm_to_vmem [thread:$0]  (!%p916_p13), %s910_s25, 128, %s912_s6, %s215_s11  }
  0x4d   : > { %p1050_p7 = scmp.ne.s32.totalorder %s1044_s30, 0 }
  0x4e   : > { %s948_s8 = sand.u32 (!%p1050_p7), 1, %s743_s19   ;;  %p1051_p3 = scmp.ne.s32.totalorder (!%p1050_p7), %s1042_s28, 0 }
  0x4f   : > { %235 = sbr.rel (%p1050_p7) target bundleno = 642 (0x282), region = 40  ;;  %s502_s17 = sshll.u32 (!%p1050_p7), %s948_s8, 3 }
  0x50   : > { %s238_s12 = scalar_lea.sflag (!%p1050_p7), [#allocation3], %s948_s8  ;;  %s241_s24 = scalar_lea.vmem (!%p1050_p7), [#allocation2], %s502_s17 }
  0x56   : > { %726 = dma.done.wait (%p1051_p3), %s238_s12, 128  }
  0x57   : > { %728 = vsyncadd (%p1051_p3), %s238_s12, 4294967168  ;;  %p1052_p13 = scmp.ne.s32.totalorder %s1040_s26, 0 }
  0x59   : > { %730 = dma.done.wait (%p1052_p13), [#allocation6], 512  }
  0x5a   : > { %732 = vsyncadd (%p1052_p13), [#allocation6], 4294966784  ;;  %v765_v0 = vmov 0.0|0.0   ;;  %vm766_vm0 = vmmov 0   ;;  %v767_v1 = vmov 0.0   ;;  %v273_v2 = vld [vmem:[#allocation5] sm:$0xff] }
  0x5b   : > { %529 = vmatprep.subr.bf16.mxu0 %v765_v0  ;;  %526 = vmatprep.mubr.msk.f32.mxu0 %vm766_vm0, %v767_v1  ;;  %v274_v3 = vld [vmem:[#allocation5 + $0x8] sm:$0xff]  ;;  %v275_v4 = vld [vmem:[#allocation5 + $0x10] sm:$0xff]  ;;  %v276_v6 = vld [vmem:[#allocation5 + $0x18] sm:$0xff]  ;;  %vm284_vm1 = vcmask 261120   ;;  %s510_s11 = sshll.u32 %s751_s21, 7  ;;  %s271_s7 = scalar_lea.vmem [#allocation7], %s502_s17 }
  0x5c   : > { %v530_v5 = vpack.c.bf16 %v274_v3, %v273_v2  ;;  %v533_v7 = vpack.c.bf16 %v276_v6, %v275_v4  ;;  %v272_v8 = vld [vmem:[%s241_s24] sm:$0xff]  ;;  %s404_s27 = sshll.u32 %s271_s7, 4  ;;  %s980_s12 = scalar_lea.hbm %s1035_s5, %s510_s11  ;;  %s982_s27 = int_to_ptr.vmem [resolvable:$true] %s404_s27 }
  0x5d   : > { %v505_v9 = vld [vmem:[%s1032_s2] ss:$0 sm:$0xff]  ;;  %s390_s24 = scalar_lea.sflag [#allocation4], %s948_s8  ;;  %s673_s26 = scalar_lea.vmem %s982_s27, 128 }
  0x5e   : > { %531 = vmatpush3.bf16.msra.mxu0 %v530_v5  ;;  %v507_v23 = vld [vmem:[%s1033_s3] ss:$0 sm:$0xff]  ;;  %p674_p4 = scmp.ne.s32.totalorder %s982_s27, %s673_s26  ;;  %s768_s21 = smov [#allocation7]  }
  0x5f   : > { %532 = vmatprep.subr.bf16.mxu0 %v765_v0  ;;  %v508_v25 = vld [vmem:[%s1034_s4] ss:$0 sm:$0xff]  ;;  %s677_s17 = sshll.u32 %s768_s21, 4  ;;  %s678_s17 = int_to_ptr.vmem [resolvable:$false] %s677_s17 }
  0x60   : > { %p675_p6 = pnand %p674_p4, %p895_p10  ;;  %s679_s28 = scalar_lea.vmem %s678_s17, 256 }
  0x61   : > { %p680_p12 = scmp.lt.s32.totalorder %s982_s27, %s678_s17  ;;  %p681_p11 = scmp.lt.s32.totalorder %s679_s28, %s673_s26 }
  0x62   : > { %534 = vmatpush3.bf16.msra.mxu0 %v533_v7  ;;  %p676_p8 = pneg %p675_p6 }
  0x63   : > { %p682_p0 = por %p681_p11, %p680_p12 }
  0x65   : > { %527 = vmatmul.mubr.msk.f32.vlgmr.msra.gmra.mrb[0].mxu0 %vm284_vm1, %v272_v8  ;;  %p683_p5 = pnand %p682_p0, %p676_p8 }
 0x138   : > { %v354_v10 = vpop.f32.mrb[0].mxu0 }
 0x139   : > { %v355_v11 = vadd.f32 %v505_v9, %v354_v10  ;;  %v528_v12 = vpop.f32.mrb[1].mxu0 }
 0x13b   : > { %v358_v13 = vsel %vm284_vm1, %v355_v11, 0.0 }
 0x13c   : > { %359 = vadd.xlane.f32.xlu0 %v358_v13 }
 0x1c9   : > { %v360_v14 = vpop.xlane.xlu0 %359 }
 0x1ca   : > { %v362_v15 = vmul.f32 0.03125, %v360_v14 }
 0x1cc   : > { %v363_v16 = vsub.f32 %v355_v11, %v362_v15 }
 0x1ce   : > { %v364_v17 = vmul.f32 %v363_v16, %v363_v16 }
 0x1d0   : > { %v365_v18 = vsel %vm284_vm1, %v364_v17, 0.0 }
 0x1d1   : > { %366 = vadd.xlane.f32.xlu0 %v365_v18 }
 0x25e   : > { %v367_v19 = vpop.xlane.xlu0 %366 }
 0x25f   : > { %v368_v20 = vmul.f32 0.03125, %v367_v19 }
 0x261   : > { %v369_v21 = vadd.f32 1e-12, %v368_v20 }
 0x263   : > { %613 = vrsqrt.f32 %v369_v21 }
 0x26d   : > { %v614_v22 = vpop.eup %613 }
 0x26e   : > { %v371_v24 = vmul.f32 %v614_v22, %v363_v16 }
 0x270   : > { %v379_v26 = vmul.f32 %v507_v23, %v371_v24 }
 0x272   : > { %v387_v27 = vadd.f32 %v508_v25, %v379_v26 }
 0x274   : > { %388 = vst.msk [vmem:[%s271_s7] sm:$0xff] %vm284_vm1, %v387_v27 }
 0x275   : > { %686 = shalt.err (!%p683_p5)
}
 0x276   : > { %s687_s8 = scalar_lea.hbm %s980_s12, 128  ;;  %s691_s6 = scalar_lea.hbm %s1035_s5, 256 }
 0x277   : > { %p688_p9 = scmp.ne.s32.totalorder %s980_s12, %s687_s8  ;;  %p692_p7 = scmp.lt.u32.totalorder %s980_s12, %s1035_s5 }
 0x278   : > { %p693_p3 = scmp.lt.u32.totalorder %s691_s6, %s687_s8  ;;  %p695_p4 = scmp.lt.u32.totalorder %s687_s8, %s980_s12 }
 0x279   : > { %p689_p1 = pnand %p688_p9, %p895_p10 }
 0x27a   : > { %p694_p13 = por %p693_p3, %p692_p7 }
 0x27b   : > { %p690_p2 = pneg %p689_p1 }
 0x27c   : > { %p696_p6 = por %p695_p4, %p694_p13 }
 0x27e   : > { %p697_p8 = pnand %p696_p6, %p690_p2 }
 0x280   : > { %700 = shalt.err (!%p697_p8)
}
 0x281   : > { %541 = dma.vmem_to_hbm [thread:$0]  (%p895_p10), %s982_s27, 128, %s980_s12, %s390_s24  }
 0x282 PF: > { %s416_s7 = sand.u32 1, %s739_s18   ;;  %p1053_p12 = scmp.ne.s32.totalorder %s1043_s29, 0 }
 0x283   : > { %p1054_p11 = scmp.ge.s32.totalorder %s759_s23, 2  ;;  %s417_s14 = scalar_lea.sflag [#allocation4], %s416_s7 }
 0x285   : > { %p552_p0 = pnand %p1054_p11, %p1053_p12 }
 0x287   : > { %734 = dma.done.wait (!%p552_p0), %s417_s14, 128  }
 0x288   : > { %736 = vsyncadd (!%p552_p0), %s417_s14, 4294967168  ;;  %s22_s23 = sadd.s32 1, %s759_s23   ;;  %s1055_s18 = smov %s743_s19 }
 0x289   : > { %p19_p5 = scmp.ge.s32.totalorder %s22_s23, 4   ;;  %s1056_s19 = smov %s747_s20 }
 0x28a   : > { %s1057_s20 = smov %s904_s15  ;;  %s1058_s21 = smov %s755_s22 }
 0x28b   : > { %s1059_s22 = smov %s1061_s9  ;;  %21 = sbr.rel (!%p19_p5) target bundleno = 7 (0x7), region = 89 }
 0x292   :  { %422 = vsyncpa [#allocation3], 1 }
 0x293   :  { %424 = vsyncpa [#allocation3 + $0x1], 1 }
 0x294   :  { %425 = vsyncpa [#allocation6], 1 }
 0x295   :  { %426 = vsyncpa [#allocation4], 1 }
 0x296   :  { %428 = vsyncpa [#allocation4 + $0x1], 1 }

</bundles_post_ra>
